<compile_context>
chip_gen: v7x
topology: tpu7x:2x2x1
jax: 0.10.0
libtpu: 0.0.40
codegen_flags: <defaults>
</compile_context>

<pallas_src>
import functools

import jax
import jax.numpy as jnp
from jax.experimental import pallas as pl
from jax.experimental.pallas import tpu as pltpu


def _round_up(x, m):
    return (x + m - 1) // m * m


def _triplet_kernel(x_ref, t_col_ref, t_row_ref, loss_ref, correct_ref, *,
                    margin, n):
    x = x_ref[...]                                        # (np, dp) f32 or bf16
    xf = x.astype(jnp.float32)
    sq = jnp.sum(xf * xf, axis=1, keepdims=True)          # (np, 1)  ||x_i||^2

    # Gram on the MXU; contract dim 1 of both operands (A @ A^T, no explicit
    # transpose materialized).  HIGHEST precision matches PyTorch f32 matmul.
    gram = jax.lax.dot_general(
        x, x, dimension_numbers=(((1,), (1,)), ((), ())),
        preferred_element_type=jnp.float32,
        precision=jax.lax.Precision.HIGHEST)              # (np, np)

    np_ = gram.shape[0]

    # f[i, j] = ||x_j||^2 - 2<x_i, x_j> = dist2[i, j] - ||x_i||^2.
    # The per-row constant ||x_i||^2 does not change the row-wise argmax/argmin,
    # so mine on f and add sq back to the mined (np, 1) vectors afterwards.
    f = jnp.transpose(sq) - 2.0 * gram                    # (np, np)

    same = t_col_ref[...] == t_row_ref[...]               # (np, np) same-class
    # Validity masks exclude zero-padded rows/cols (true batch size is n).
    valid_j = jax.lax.broadcasted_iota(jnp.int32, (1, np_), 1) < n
    valid_i = jax.lax.broadcasted_iota(jnp.int32, (np_, 1), 0) < n

    pos = jnp.logical_and(same, valid_j)                   # hard-positive cands
    neg = jnp.logical_and(jnp.logical_not(same), valid_j)  # hard-negative cands

    ap_f = jnp.max(jnp.where(pos, f, -jnp.inf), axis=1, keepdims=True)  # (np,1)
    an_f = jnp.min(jnp.where(neg, f, jnp.inf), axis=1, keepdims=True)   # (np,1)

    # clamp(min=1e-12).sqrt() applied only to the 2*np mined values.
    dist_ap = jnp.sqrt(jnp.maximum(ap_f + sq, 1e-12))      # (np, 1)
    dist_an = jnp.sqrt(jnp.maximum(an_f + sq, 1e-12))      # (np, 1)

    # MarginRankingLoss(margin)(dist_an, dist_ap, y=1) = mean(relu(ap - an + m))
    per = jnp.maximum(dist_ap - dist_an + margin, 0.0)
    per = per * valid_i.astype(jnp.float32)                # drop padded anchors

    loss_ref[0] = jnp.sum(per) * (1.0 / n)                 # mean over true batch
    correct_ref[0] = jnp.sum(
        jnp.logical_and(dist_an >= dist_ap, valid_i).astype(jnp.int32))


def ori_triplet_loss(inputs, targets, margin=0.3):
    """inputs: (n, feat_dim) float (f32 or bf16); targets: (n,) int labels.

    Returns (loss, correct) matching OriTripletLoss.forward.
    """
    n, d = inputs.shape
    n_pad = _round_up(n, 8)        # sublane multiple (f32)
    d_pad = _round_up(d, 128)      # lane multiple

    x = inputs
    if x.dtype != jnp.bfloat16:    # keep bf16 native for the MXU; else f32
        x = x.astype(jnp.float32)
    if (n_pad, d_pad) != (n, d):
        x = jnp.pad(x, ((0, n_pad - n), (0, d_pad - d)))  # zero rows/cols

    t = targets.astype(jnp.int32)
    if n_pad != n:
        t = jnp.pad(t, (0, n_pad - n), constant_values=-1)
    t_col = t.reshape(n_pad, 1)
    t_row = t.reshape(1, n_pad)

    kernel = functools.partial(_triplet_kernel, margin=float(margin), n=n)
    loss, correct = pl.pallas_call(
        kernel,
        out_shape=(
            jax.ShapeDtypeStruct((1,), jnp.float32),
            jax.ShapeDtypeStruct((1,), jnp.int32),
        ),
        # Small problem: whole arrays resident in VMEM, single invocation.
        # TODO(synk): for very large batches (n >~ 2k) tile the candidate (j)
        # axis with a grid + running max/min accumulators to fit v7x's 64 MiB
        # VMEM; unnecessary at typical reID training batch sizes.
        in_specs=[
            pl.BlockSpec(memory_space=pltpu.MemorySpace.VMEM),
            pl.BlockSpec(memory_space=pltpu.MemorySpace.VMEM),
            pl.BlockSpec(memory_space=pltpu.MemorySpace.VMEM),
        ],
        out_specs=(
            pl.BlockSpec(memory_space=pltpu.MemorySpace.SMEM),
            pl.BlockSpec(memory_space=pltpu.MemorySpace.SMEM),
        ),
    )(x, t_col, t_row)
    return loss[0], correct[0]


if __name__ == "__main__":
    key = jax.random.PRNGKey(0)
    margin = 0.3

    def reference(x, targets, m):
        xf = x.astype(jnp.float32)
        sq = jnp.sum(xf * xf, axis=1, keepdims=True)
        g = jnp.dot(xf, xf.T, precision=jax.lax.Precision.HIGHEST)
        dist = jnp.sqrt(jnp.maximum(sq + sq.T - 2.0 * g, 1e-12))
        msk = targets[:, None] == targets[None, :]
        ap = jnp.max(jnp.where(msk, dist, -jnp.inf), axis=1)
        an = jnp.min(jnp.where(msk, jnp.inf, dist), axis=1)
        loss = jnp.mean(jnp.maximum(ap - an + m, 0.0))
        correct = jnp.sum((an >= ap).astype(jnp.int32))
        return loss, correct

    k1, k2 = jax.random.split(key)

    # Case 1: typical PK-sampled batch (4 ids x 2 samples), f32 features.
    batch, feat_dim = 8, 32
    x1 = jax.random.normal(k1, (batch, feat_dim), dtype=jnp.float32)
    t1 = jnp.array([0, 0, 1, 1, 2, 2, 3, 3], dtype=jnp.int32)
    loss1, correct1 = ori_triplet_loss(x1, t1, margin=margin)
    jax.block_until_ready((loss1, correct1))
    ref_loss1, ref_correct1 = reference(x1, t1, margin)
    assert jnp.allclose(loss1, ref_loss1, rtol=1e-3, atol=1e-4), (loss1, ref_loss1)
    assert int(correct1) == int(ref_correct1), (correct1, ref_correct1)

    # Case 2: batch not a multiple of 8 (exercises row padding + validity mask).
    batch2 = 6
    x2 = jax.random.normal(k2, (batch2, feat_dim), dtype=jnp.float32)
    t2 = jnp.array([0, 0, 1, 1, 2, 2], dtype=jnp.int32)
    loss2, correct2 = ori_triplet_loss(x2, t2, margin=margin)
    jax.block_until_ready((loss2, correct2))
    ref_loss2, ref_correct2 = reference(x2, t2, margin)
    assert jnp.allclose(loss2, ref_loss2, rtol=1e-3, atol=1e-4), (loss2, ref_loss2)
    assert int(correct2) == int(ref_correct2), (correct2, ref_correct2)

    print("KERNEL_OK")
</pallas_src>

<mosaic_0001>
module attributes {stable_mosaic.version = 11 : i64} {
  func.func @_triplet_kernel(%arg0: memref<8x128xf32, #tpu.memory_space<vmem>>, %arg1: memref<8x1xi32, #tpu.memory_space<vmem>>, %arg2: memref<1x8xi32, #tpu.memory_space<vmem>>, %arg3: memref<1xf32, #tpu.memory_space<smem>>, %arg4: memref<1xi32, #tpu.memory_space<smem>>) attributes {dimension_semantics = [], scalar_prefetch = 0 : i64, scratch_operands = 0 : i64, tpu.core_type = #tpu.core_type<tc>} {
    %c0 = arith.constant 0 : index
    %c0_0 = arith.constant 0 : index
    %0 = vector.load %arg0[%c0, %c0_0] : memref<8x128xf32, #tpu.memory_space<vmem>>, vector<8x128xf32>
    %1 = arith.mulf %0, %0 : vector<8x128xf32>
    %cst = arith.constant dense<0.000000e+00> : vector<8xf32>
    %2 = vector.multi_reduction <add>, %1, %cst [1] : vector<8x128xf32> to vector<8xf32>
    %3 = vector.shape_cast %2 : vector<8xf32> to vector<8x1xf32>
    %cst_1 = arith.constant dense<0.000000e+00> : vector<8x8xf32>
    %4 = tpu.matmul %0, %0, %cst_1 {dimension_numbers = #tpu.dot_dimension_numbers<[1], [1], [0], [0], [0, 0, 1, 0], [], []>, precision = #tpu.contract_precision<fp32>} : vector<8x128xf32>, vector<8x128xf32>, vector<8x8xf32> -> vector<8x8xf32>
    %5 = tpu.transpose %3, [1, 0] : vector<8x1xf32> -> vector<1x8xf32>
    %cst_2 = arith.constant 2.000000e+00 : f32
    %6 = vector.broadcast %cst_2 : f32 to vector<8x8xf32>
    %7 = arith.mulf %6, %4 : vector<8x8xf32>
    %8 = vector.broadcast %5 : vector<1x8xf32> to vector<8x8xf32>
    %9 = arith.subf %8, %7 : vector<8x8xf32>
    %c0_3 = arith.constant 0 : index
    %c0_4 = arith.constant 0 : index
    %10 = vector.load %arg1[%c0_3, %c0_4] : memref<8x1xi32, #tpu.memory_space<vmem>>, vector<8x1xi32>
    %c0_5 = arith.constant 0 : index
    %c0_6 = arith.constant 0 : index
    %11 = vector.load %arg2[%c0_5, %c0_6] : memref<1x8xi32, #tpu.memory_space<vmem>>, vector<1x8xi32>
    %12 = vector.broadcast %10 : vector<8x1xi32> to vector<8x8xi32>
    %13 = vector.broadcast %11 : vector<1x8xi32> to vector<8x8xi32>
    %14 = arith.cmpi eq, %12, %13 : vector<8x8xi32>
    %15 = tpu.iota {dimensions = array<i32: 1>} : vector<1x8xi32>
    %c8_i32 = arith.constant 8 : i32
    %16 = vector.broadcast %c8_i32 : i32 to vector<1x8xi32>
    %17 = arith.cmpi slt, %15, %16 : vector<1x8xi32>
    %18 = tpu.iota {dimensions = array<i32: 0>} : vector<8x1xi32>
    %c8_i32_7 = arith.constant 8 : i32
    %19 = vector.broadcast %c8_i32_7 : i32 to vector<8x1xi32>
    %20 = arith.cmpi slt, %18, %19 : vector<8x1xi32>
    %21 = vector.broadcast %17 : vector<1x8xi1> to vector<8x8xi1>
    %22 = arith.andi %14, %21 : vector<8x8xi1>
    %cst_8 = arith.constant dense<true> : vector<8x8xi1>
    %23 = arith.xori %14, %cst_8 : vector<8x8xi1>
    %24 = vector.broadcast %17 : vector<1x8xi1> to vector<8x8xi1>
    %25 = arith.andi %23, %24 : vector<8x8xi1>
    %cst_9 = arith.constant 0xFF800000 : f32
    %26 = vector.broadcast %cst_9 : f32 to vector<8x8xf32>
    %27 = arith.select %22, %9, %26 : vector<8x8xi1>, vector<8x8xf32>
    %cst_10 = arith.constant dense<0xFF800000> : vector<8xf32>
    %28 = vector.multi_reduction <maximumf>, %27, %cst_10 [1] : vector<8x8xf32> to vector<8xf32>
    %29 = vector.shape_cast %28 : vector<8xf32> to vector<8x1xf32>
    %cst_11 = arith.constant 0x7F800000 : f32
    %30 = vector.broadcast %cst_11 : f32 to vector<8x8xf32>
    %31 = arith.select %25, %9, %30 : vector<8x8xi1>, vector<8x8xf32>
    %cst_12 = arith.constant dense<0x7F800000> : vector<8xf32>
    %32 = vector.multi_reduction <minimumf>, %31, %cst_12 [1] : vector<8x8xf32> to vector<8xf32>
    %33 = vector.shape_cast %32 : vector<8xf32> to vector<8x1xf32>
    %34 = arith.addf %29, %3 : vector<8x1xf32>
    %cst_13 = arith.constant 9.99999996E-13 : f32
    %35 = vector.broadcast %cst_13 : f32 to vector<8x1xf32>
    %36 = arith.maximumf %34, %35 : vector<8x1xf32>
    %37 = math.sqrt %36 : vector<8x1xf32>
    %38 = arith.addf %33, %3 : vector<8x1xf32>
    %cst_14 = arith.constant 9.99999996E-13 : f32
    %39 = vector.broadcast %cst_14 : f32 to vector<8x1xf32>
    %40 = arith.maximumf %38, %39 : vector<8x1xf32>
    %41 = math.sqrt %40 : vector<8x1xf32>
    %42 = arith.subf %37, %41 : vector<8x1xf32>
    %cst_15 = arith.constant 3.000000e-01 : f32
    %43 = vector.broadcast %cst_15 : f32 to vector<8x1xf32>
    %44 = arith.addf %42, %43 : vector<8x1xf32>
    %cst_16 = arith.constant 0.000000e+00 : f32
    %45 = vector.broadcast %cst_16 : f32 to vector<8x1xf32>
    %46 = arith.maximumf %44, %45 : vector<8x1xf32>
    %47 = arith.extui %20 : vector<8x1xi1> to vector<8x1xi32>
    %48 = arith.sitofp %47 : vector<8x1xi32> to vector<8x1xf32>
    %49 = arith.mulf %46, %48 : vector<8x1xf32>
    %50 = vector.shape_cast %49 : vector<8x1xf32> to vector<1x8x1xf32>
    %cst_17 = arith.constant dense<0.000000e+00> : vector<1xf32>
    %51 = vector.multi_reduction <add>, %50, %cst_17 [1, 2] : vector<1x8x1xf32> to vector<1xf32>
    %52 = vector.shape_cast %51 : vector<1xf32> to vector<1x1x1xf32>
    %53 = vector.extract %52[0, 0, 0] : f32 from vector<1x1x1xf32>
    %cst_18 = arith.constant 1.250000e-01 : f32
    %54 = arith.mulf %53, %cst_18 : f32
    %c0_19 = arith.constant 0 : index
    %55 = memref.load %arg3[%c0_19] : memref<1xf32, #tpu.memory_space<smem>>
    memref.store %54, %arg3[%c0_19] : memref<1xf32, #tpu.memory_space<smem>>
    %56 = arith.cmpf oge, %41, %37 : vector<8x1xf32>
    %57 = arith.andi %56, %20 : vector<8x1xi1>
    %58 = arith.extui %57 : vector<8x1xi1> to vector<8x1xi32>
    %59 = vector.shape_cast %58 : vector<8x1xi32> to vector<1x8x1xi32>
    %cst_20 = arith.constant dense<0> : vector<1xi32>
    %60 = vector.multi_reduction <add>, %59, %cst_20 [1, 2] : vector<1x8x1xi32> to vector<1xi32>
    %61 = vector.shape_cast %60 : vector<1xi32> to vector<1x1x1xi32>
    %62 = vector.extract %61[0, 0, 0] : i32 from vector<1x1x1xi32>
    %c0_21 = arith.constant 0 : index
    %63 = memref.load %arg4[%c0_21] : memref<1xi32, #tpu.memory_space<smem>>
    memref.store %62, %arg4[%c0_21] : memref<1xi32, #tpu.memory_space<smem>>
    return
  }
}

</mosaic_0001>

<bundles_post_ra>
// kernel: tpu_custom_call.1
= control target key start
LH: loop header
LB: loop body
LE: loop exit
PB: predicated region body
PF: predicated region fallthrough
CT: control target
= control target key end

     0   :  { %10 = vsyncpa [#allocation3], 0  ;;  %s774_s0 = inlined_call_operand.vmem [shape: f32[8,128], index: 0, kind: input, shape index: {}]   ;;  %s775_s1 = inlined_call_operand.vmem [shape: s32[8,1], index: 1, kind: input, shape index: {}]   ;;  %s776_s2 = inlined_call_operand.vmem [shape: s32[1,8], index: 2, kind: input, shape index: {}]   ;;  %s777_s3 = inlined_call_operand.hbm [shape: f32[1], index: 3, kind: output, shape index: {0}]   ;;  %s778_s4 = inlined_call_operand.hbm [shape: s32[1], index: 4, kind: output, shape index: {1}]  }
   0x1   :  { %v18_v0 = vld [vmem:[%s774_s0] sm:$0xff] }
   0x2   :  { %11 = vsyncpa [#allocation5], 0  ;;  %v19_v1 = vmul.f32 %v18_v0, %v18_v0  ;;  %v23_v2 = vand.u32 4294901760, %v18_v0  ;;  %v702_v3 = vmov 0.0   ;;  %vm703_vm0 = vmmov 0   ;;  %v506_v9 = vld [vmem:[%s775_s1] sm:$0xff] }
   0x3   :  { %624 = vmatprep.subr.mxu1 %v702_v3  ;;  %639 = vmatprep.subr.mxu0 %v702_v3  ;;  %v704_v8 = vmov 0   ;;  %v501_v16 = vlaneseq  ;;  %v611_v18 = vld [vmem:[%s776_s2] ss:$0 sm:$0xff]  ;;  %vm705_vm3 = vmmov 1   ;;  %vm528_vm6 = vcmask 64512   ;;  %s678_s23 = scalar_lea.hbm %s777_s3, 16 }
   0x4   :  { %626 = vmatprep.mubr.msk.f32.mxu1 %vm703_vm0, %v702_v3  ;;  %641 = vmatprep.mubr.msk.f32.mxu0 %vm703_vm0, %v702_v3  ;;  %v89_v4 = vsub.f32 %v18_v0, %v23_v2  ;;  %vm560_vm13 = vcmask 7168   ;;  %p679_p0 = scmp.ne.s32.totalorder %s777_s3, %s678_s23  ;;  %p682_p1 = scmp.lt.u32.totalorder %s678_s23, %s777_s3 }
   0x5   :  { %20 = vadd.xlane.f32.xlu0 %v19_v1  ;;  %625 = vmatpush3.xpose.msra.mxu1 %v23_v2  ;;  %v502_v17 = vshrl.u32 %v501_v16, 7  ;;  %v517_v19 = vand.u32 127, %v501_v16 }
   0x6   :  { %640 = vmatpush3.xpose.msra.mxu0 %v23_v2  ;;  %629 = vmatprep.subr.mxu1 %v702_v3  ;;  %v90_v5 = vand.u32 4294901760, %v89_v4  ;;  %p684_p2 = pnand %p682_p1, %p679_p0 }
   0x7   :  { %644 = vmatprep.subr.mxu0 %v702_v3  ;;  %673 = vset.pattern.permute.xlu0 %v704_v8  ;;  %v503_v21 = vsub.s32 0, %v502_v17  ;;  %vm518_vm2 = vcmp.lt.s32.totalorder %v517_v19, 8 }
   0x8   :  { %v91_v6 = vsub.f32 %v89_v4, %v90_v5 }
   0x9   :  { %642 = vmatmul.mubr.f32.vlgmr.msra.gmra.mrb[0].mxu0 %v90_v5 }
   0xa   :  { %645 = vmatpush3.xpose.msra.mxu0 %v90_v5  ;;  %646 = vmatprep.mubr.msk.f32.mxu0 %vm703_vm0, %v702_v3  ;;  %v92_v7 = vand.u32 4294901760, %v91_v6 }
   0xb   :  { %649 = vmatprep.subr.mxu0 %v702_v3 }
   0xc   :  { %627 = vmatmul.mubr.f32.vlgmr.msra.gmra.mrb[0].mxu1 %v92_v7 }
   0xd   :  { %630 = vmatpush3.xpose.msra.mxu1 %v92_v7  ;;  %631 = vmatprep.mubr.msk.f32.mxu1 %vm703_vm0, %v702_v3 }
   0xe   :  { %634 = vmatprep.subr.mxu1 %v702_v3 }
  0x11   :  { %647 = vmatmul.mubr.f32.vlgmr.msra.gmra.mrb[0].mxu0 %v23_v2 }
  0x12   :  { %650 = vmatpush3.xpose.msra.mxu0 %v23_v2  ;;  %651 = vmatprep.mubr.msk.f32.mxu0 %vm703_vm0, %v702_v3 }
  0x14   :  { %632 = vmatmul.mubr.f32.vlgmr.msra.gmra.mrb[0].mxu1 %v23_v2 }
  0x15   :  { %635 = vmatpush3.xpose.msra.mxu1 %v89_v4  ;;  %636 = vmatprep.mubr.msk.f32.mxu1 %vm703_vm0, %v702_v3 }
  0x19   :  { %652 = vmatmul.mubr.f32.vlgmr.msra.gmra.mrb[0].mxu0 %v23_v2 }
  0x1b   :  { %509 = vperm.xlu0 %673, %v506_v9  }
  0x1c   :  { %637 = vmatmul.mubr.f32.vlgmr.msra.gmra.mrb[0].mxu1 %v89_v4 }
  0x92   :  { %v21_v10 = vpop.xlane.xlu0 %20 }
  0x93   :  { %468 = vxpose.xlu1.b32.start.end [1/1] (short) (narrow) %v21_v10, 8 }
  0x9a   :  { %v510_v20 = vpop.permute.xlu0 %509 }
  0x9b   :  { %vm515_vm1 = vcmp.eq.s32.totalorder %v510_v20, %v611_v18 }
  0x9c   :  { %vm525_vm4 = vmxor %vm515_vm1, %vm705_vm3 }
  0x9d   :  { %vm524_vm5 = vmand %vm515_vm1, %vm518_vm2 }
  0x9e   :  { %vm526_vm7 = vmand %vm525_vm4, %vm518_vm2 }
  0xec   :  { %v464_v11 = vpop.f32.mrb[0].mxu0 }
  0xed   :  { %v653_v12 = vpop.f32.mrb[1].mxu0 }
  0xef   :  { %v244_v13 = vpop.f32.mrb[0].mxu1 }
  0xf0   :  { %v654_v14 = vadd.f32 %v464_v11, %v244_v13  ;;  %v638_v15 = vpop.f32.mrb[1].mxu1 }
  0xf2   :  { %v500_v23 = vmul.f32 2.0, %v654_v14 }
 0x113   :  { %v484_v22 = vpop.trf.xlu1 }
 0x114   :  { %v504_v24 = vrot.slane %v484_v22, %v503_v21 }
 0x116   :  { %v505_v25 = vsub.f32 %v504_v24, %v500_v23 }
 0x118   :  { %v527_v26 = vsel %vm524_vm5, %v505_v25, -inf  ;;  %v532_v28 = vsel %vm526_vm7, %v505_v25, inf }
 0x119   :  { %v529_v27 = vsel %vm528_vm6, %v527_v26, -inf  ;;  %v533_v29 = vsel %vm528_vm6, %v532_v28, inf }
 0x11a   :  { %530 = vmax.xlane.f32.xlu1 %v529_v27 }
 0x11e   :  { %534 = vmin.xlane.f32.xlu1 %v533_v29 }
 0x1a7   :  { %v531_v30 = vpop.xlane.xlu1 %530 }
 0x1a8   :  { %v536_v31 = vadd.f32 %v531_v30, %v21_v10 }
 0x1aa   :  { %v537_v32 = vmax.f32 %v536_v31, 1e-12 }
 0x1ab   :  { %v535_v33 = vpop.xlane.xlu1 %534 }
 0x1ac   :  { %674 = vrsqrt.f32 %v537_v32  ;;  %v545_v34 = vadd.f32 %v535_v33, %v21_v10  ;;  %vm540_vm8 = vcmp.eq.f32.partialorder %v537_v32, inf  ;;  %v543_v41 = vand.u32 2147483648, %v537_v32 }
 0x1ad   :  { %vm542_vm10 = vcmp.eq.f32.partialorder %v537_v32, 0.0 }
 0x1ae   :  { %v546_v35 = vmax.f32 %v545_v34, 1e-12 }
 0x1b0   :  { %676 = vrsqrt.f32 %v546_v35  ;;  %vm549_vm9 = vcmp.eq.f32.partialorder %v546_v35, inf  ;;  %v552_v42 = vand.u32 2147483648, %v546_v35  ;;  %vm551_vm11 = vcmp.eq.f32.partialorder %v546_v35, 0.0 }
 0x1b6   :  { %v675_v36 = vpop.eup %674 }
 0x1b7   :  { %v539_v37 = vmul.f32 %v675_v36, %v537_v32 }
 0x1b9   :  { %v541_v39 = vsel %vm540_vm8, %v537_v32, %v539_v37 }
 0x1ba   :  { %v677_v38 = vpop.eup %676  ;;  %v544_v44 = vsel %vm542_vm10, %v543_v41, %v541_v39 }
 0x1bb   :  { %v548_v40 = vmul.f32 %v677_v38, %v546_v35 }
 0x1bd   :  { %v550_v43 = vsel %vm549_vm9, %v546_v35, %v548_v40 }
 0x1be   :  { %v553_v45 = vsel %vm551_vm11, %v552_v42, %v550_v43 }
 0x1bf   :  { %v554_v46 = vsub.f32 %v544_v44, %v553_v45  ;;  %vm574_vm12 = vcmp.ge.f32.partialorder %v553_v45, %v544_v44 }
 0x1c0   :  { %v576_v50 = vsel %vm574_vm12, 1, %v704_v8 }
 0x1c1   :  { %v555_v47 = vadd.f32 0.3, %v554_v46  ;;  %v577_v51 = vrot.slane %v576_v50, 4 }
 0x1c3   :  { %v556_v48 = vmax.f32 %v555_v47, 0.0  ;;  %v578_v52 = vadd.s32 %v577_v51, %v576_v50 }
 0x1c5   :  { %v561_v49 = vsel %vm560_vm13, %v556_v48, 0.0  ;;  %v579_v54 = vrot.slane %v578_v52, 2 }
 0x1c6   :  { %562 = vadd.xlane.f32.xlu1 %v561_v49 }
 0x1c7   :  { %v580_v57 = vadd.s32 %v579_v54, %v578_v52 }
 0x1c9   :  { %v581_v60 = vrot.slane %v580_v57, 1 }
 0x1cb   :  { %v582_v63 = vadd.s32 %v581_v60, %v580_v57 }
 0x253   :  { %v563_v53 = vpop.xlane.xlu1 %562 }
 0x254   :  { %v564_v55 = vrot.slane %v563_v53, 4 }
 0x256   :  { %v565_v56 = vadd.f32 %v564_v55, %v563_v53 }
 0x258   :  { %v566_v58 = vrot.slane %v565_v56, 2 }
 0x25a   :  { %v567_v59 = vadd.f32 %v566_v58, %v565_v56 }
 0x25c   :  { %v568_v61 = vrot.slane %v567_v59, 1 }
 0x25e   :  { %v569_v62 = vadd.f32 %v568_v61, %v567_v59 }
 0x260   :  { %663 = vpush %v569_v62 }
 0x261   :  { %665 = vpush %v582_v63 }
 0x291   :  { %s664_s1 = spop %663 }
 0x292   :  { %s571_s2 = smul.f32 0.125, %s664_s1  ;;  %s666_s20 = spop %665 }
 0x293   :  { %585 = sst [smem:[#allocation4]] %s666_s20 }
 0x294   :  { %573 = sst [smem:[#allocation2]] %s571_s2 }
 0x295   :  { %687 = shalt.err (!%p684_p2)
}
 0x296   :  { %s706_s28 = smov [#allocation2]   ;;  %s688_s7 = scalar_lea.hbm %s778_s4, 16 }
 0x297   :  { %593 = dma.smem_to_hbm %s706_s28, 16, %s777_s3, [#allocation3]  }
 0x298   :  { %p689_p3 = scmp.ne.s32.totalorder %s778_s4, %s688_s7  ;;  %p692_p4 = scmp.lt.u32.totalorder %s688_s7, %s778_s4 }
 0x29a   :  { %p694_p5 = pnand %p692_p4, %p689_p3 }
 0x29c   :  { %697 = shalt.err (!%p694_p5)
}
 0x29d   :  { %s707_s12 = smov [#allocation4]  }
 0x29e   :  { %601 = dma.smem_to_hbm %s707_s12, 16, %s778_s4, [#allocation5]  }
 0x29f   :  { %698 = dma.done.wait [#allocation3], 16  }
 0x2a0   :  { %699 = vsyncadd [#allocation3], 4294967280 }
 0x2a1   :  { %700 = dma.done.wait [#allocation5], 16  }
 0x2a2   :  { %701 = vsyncadd [#allocation5], 4294967280 }
 0x2a3   :  { %608 = sfence }
 0x2a4   :  { %609 = vsyncpa [#allocation3], 1 }
 0x2a5   :  { %610 = vsyncpa [#allocation5], 1 }

</bundles_post_ra>
